<compile_context>
chip_gen: v7x
topology: tpu7x:2x2x1
jax: 0.10.0
libtpu: 0.0.40
codegen_flags: <defaults>
</compile_context>

<pallas_src>
import jax
import jax.numpy as jnp
from jax.experimental import pallas as pl
from jax.experimental.pallas import tpu as pltpu


def _bitgatenet_kernel(x_ref, covm_ref, b_ref, out_ref):
    """Fully folded (conv3x3 + GAP + FC) for a tile of TB images.

    x_ref    : (TB, H*W)  flattened images (lane-dense)
    covm_ref : (H*W, NC)  folded coverage @ conv @ fc weights / HW (constant)
    b_ref    : (1, NC)    folded bias (conv_b @ fc_w.T + fc_b)    (constant)
    out_ref  : (TB, NC)   logits
    """
    out_ref[...] = jnp.dot(x_ref[...], covm_ref[...],
                           preferred_element_type=jnp.float32) + b_ref[...]


def _coverage_matrix(H, W):
    """Cov[i*W + j, kh*3 + kw] = 1 iff pixel (i, j) lies inside the shifted
    HxW window (kh, kw) of the zero-padded image (i.e. it contributes to the
    conv tap (kh, kw) for some valid output position)."""
    i = jnp.arange(H)
    j = jnp.arange(W)
    kh = jnp.arange(3)
    kw = jnp.arange(3)
    oi = i[:, None] + 1 - kh[None, :]                         # (H, 3)
    oj = j[:, None] + 1 - kw[None, :]                         # (W, 3)
    ok_i = (oi >= 0) & (oi < H)                               # (H, 3)
    ok_j = (oj >= 0) & (oj < W)                               # (W, 3)
    cov = ok_i[:, None, :, None] & ok_j[None, :, None, :]     # (H, W, 3, 3)
    return cov.astype(jnp.float32).reshape(H * W, 9)


def bitgatenet_v2_forward(x, conv_w, conv_b, fc_w, fc_b, *, batch_tile=8192):
    """x: (B, 1, H, W) float32 NCHW; returns logits (B, num_classes).

    NOTE: the exact folding below is only valid because dw_stage/embed are
    Identity and dropout is eval-mode identity (everything between conv1 and
    fc is linear). A config with a nonlinear stage must not use this kernel.
    """
    B, Cin, H, W = x.shape
    assert Cin == 1, "BitGateNetV2.conv1 expects a single input channel"
    C1 = conv_w.shape[0]
    NC = fc_w.shape[0]
    HW = H * W
    assert fc_w.shape[1] == C1, "folding assumes fc_in == c1 (Identity stages)"

    # ---- setup-time weight folding (tiny matrices, done once) ----
    w2d = conv_w.reshape(C1, 9).astype(jnp.float32)           # (C1, 9), k = kh*3+kw
    fcw_t = fc_w.astype(jnp.float32).T                        # (C1, NC)
    m_fold = (w2d.T @ fcw_t) / float(HW)                      # (9, NC)
    cov = _coverage_matrix(H, W)                              # (HW, 9)
    covm = cov @ m_fold                                       # (HW, NC) ~ HW*NC*4 B
    b_fold = (conv_b.astype(jnp.float32) @ fcw_t
              + fc_b.astype(jnp.float32)).reshape(1, NC)      # (1, NC)

    # ---- input layout: lane-dense flattened rows, batch-tiled grid ----
    x_flat = x.reshape(B, HW).astype(jnp.float32)             # (B, HW)

    TB = min(batch_tile, B)
    if TB == B and B >= 2048:
        # Whole batch fits one tile but is large: split so the grid has >= 2
        # steps (v7x dual-TC sharding + input double-buffer overlap).
        TB = -(-B // 2)
    if TB < B:
        # Sublane alignment for tiled first dim ((8,128) constraint).
        TB = max(8, (TB // 8) * 8)
    grid = (pl.cdiv(B, TB),)

    cost = pl.CostEstimate(
        flops=2 * B * HW * NC,
        transcendentals=0,
        bytes_accessed=B * HW * 4 + B * NC * 4 + HW * NC * 4 + NC * 4,
    )

    out = pl.pallas_call(
        _bitgatenet_kernel,
        out_shape=jax.ShapeDtypeStruct((B, NC), jnp.float32),
        grid=grid,
        in_specs=[
            pl.BlockSpec((TB, HW), lambda b: (b, 0)),         # streamed images
            pl.BlockSpec((HW, NC), lambda b: (0, 0)),         # constant, resident
            pl.BlockSpec((1, NC), lambda b: (0, 0)),          # constant, resident
        ],
        out_specs=pl.BlockSpec((TB, NC), lambda b: (b, 0)),
        compiler_params=pltpu.CompilerParams(
            dimension_semantics=("parallel",)),
        cost_estimate=cost,
    )(x_flat, covm, b_fold)

    return out


def _reference(x, conv_w, conv_b, fc_w, fc_b):
    """Pure-JAX reference mirroring the PyTorch forward."""
    y = jax.lax.conv_general_dilated(
        x, conv_w, window_strides=(1, 1), padding="SAME",
        dimension_numbers=("NCHW", "OIHW", "NCHW"))
    y = y + conv_b[None, :, None, None]
    pooled = jnp.mean(y, axis=(2, 3))                         # (B, C1)
    return pooled @ fc_w.T + fc_b                             # (B, NC)


if __name__ == "__main__":
    # Module config: width_mult=1.0 -> c1 = 8; dw_stage/embed are Identity,
    # so fc_in == c1.  num_classes chosen as 10.
    B, H, W = 8, 16, 16
    C1, NUM_CLASSES = 8, 10

    key = jax.random.PRNGKey(0)
    k1, k2, k3, k4, k5 = jax.random.split(key, 5)
    conv_w = jax.random.normal(k1, (C1, 1, 3, 3), jnp.float32) * 0.1
    conv_b = jax.random.normal(k2, (C1,), jnp.float32) * 0.1
    fc_w = jax.random.normal(k3, (NUM_CLASSES, C1), jnp.float32) * 0.1
    fc_b = jax.random.normal(k4, (NUM_CLASSES,), jnp.float32) * 0.1
    x = jax.random.normal(k5, (B, 1, H, W), jnp.float32)

    out = bitgatenet_v2_forward(x, conv_w, conv_b, fc_w, fc_b)
    out = jax.block_until_ready(out)

    ref = jax.block_until_ready(_reference(x, conv_w, conv_b, fc_w, fc_b))
    assert out.shape == (B, NUM_CLASSES), out.shape
    assert jnp.allclose(out, ref, atol=1e-4, rtol=1e-4), (out, ref)

    print("KERNEL_OK")
</pallas_src>

<mosaic_0001>
module attributes {stable_mosaic.version = 11 : i64} {
  func.func @_bitgatenet_kernel(%arg0: i32, %arg1: memref<8x256xf32, #tpu.memory_space<vmem>>, %arg2: memref<256x10xf32, #tpu.memory_space<vmem>>, %arg3: memref<1x10xf32, #tpu.memory_space<vmem>>, %arg4: memref<8x10xf32, #tpu.memory_space<vmem>>) attributes {dimension_semantics = [#tpu.dimension_semantics<parallel>], iteration_bounds = array<i64: 1>, scalar_prefetch = 0 : i64, scratch_operands = 0 : i64, tpu.core_type = #tpu.core_type<tc>, window_params = [{transform_indices = @transform_0, window_bounds = array<i64: 8, 256>}, {pipeline_mode = #tpu.pipeline_mode<synchronous>, transform_indices = @transform_1, window_bounds = array<i64: 256, 10>}, {pipeline_mode = #tpu.pipeline_mode<synchronous>, transform_indices = @transform_2, window_bounds = array<i64: 1, 10>}, {transform_indices = @transform_3, window_bounds = array<i64: 8, 10>}]} {
    %c0 = arith.constant 0 : index
    %c0_0 = arith.constant 0 : index
    %0 = vector.load %arg1[%c0, %c0_0] : memref<8x256xf32, #tpu.memory_space<vmem>>, vector<8x256xf32>
    %c0_1 = arith.constant 0 : index
    %c0_2 = arith.constant 0 : index
    %1 = vector.load %arg2[%c0_1, %c0_2] : memref<256x10xf32, #tpu.memory_space<vmem>>, vector<256x10xf32>
    %cst = arith.constant dense<0.000000e+00> : vector<8x10xf32>
    %2 = tpu.matmul %0, %1, %cst {dimension_numbers = #tpu.dot_dimension_numbers<[1], [0], [0], [1], [0, 0, 1, 1], [], []>} : vector<8x256xf32>, vector<256x10xf32>, vector<8x10xf32> -> vector<8x10xf32>
    %c0_3 = arith.constant 0 : index
    %c0_4 = arith.constant 0 : index
    %3 = vector.load %arg3[%c0_3, %c0_4] : memref<1x10xf32, #tpu.memory_space<vmem>>, vector<1x10xf32>
    %4 = vector.broadcast %3 : vector<1x10xf32> to vector<8x10xf32>
    %5 = arith.addf %2, %4 : vector<8x10xf32>
    %c0_5 = arith.constant 0 : index
    %c0_6 = arith.constant 0 : index
    %6 = vector.load %arg4[%c0_5, %c0_6] : memref<8x10xf32, #tpu.memory_space<vmem>>, vector<8x10xf32>
    tpu.vector_store %arg4[%c0_5, %c0_6], %5 {strides = array<i32>} : memref<8x10xf32, #tpu.memory_space<vmem>>, vector<8x10xf32>,
    return
  }
  func.func @transform_0(%arg0: i32) -> (i32, i32) {
    %c0_i32 = arith.constant 0 : i32
    %c0_i32_0 = arith.constant 0 : i32
    return %arg0, %c0_i32 : i32, i32
  }
  func.func @transform_1(%arg0: i32) -> (i32, i32) {
    %c0_i32 = arith.constant 0 : i32
    %c0_i32_0 = arith.constant 0 : i32
    %c0_i32_1 = arith.constant 0 : i32
    return %c0_i32, %c0_i32_0 : i32, i32
  }
  func.func @transform_2(%arg0: i32) -> (i32, i32) {
    %c0_i32 = arith.constant 0 : i32
    %c0_i32_0 = arith.constant 0 : i32
    %c0_i32_1 = arith.constant 0 : i32
    return %c0_i32, %c0_i32_0 : i32, i32
  }
  func.func @transform_3(%arg0: i32) -> (i32, i32) {
    %c0_i32 = arith.constant 0 : i32
    %c0_i32_0 = arith.constant 0 : i32
    return %arg0, %c0_i32 : i32, i32
  }
}

</mosaic_0001>

<bundles_post_ra>
// kernel: tpu_custom_call.1
= control target key start
LH: loop header
LB: loop body
LE: loop exit
PB: predicated region body
PF: predicated region fallthrough
CT: control target
= control target key end

     0   :  { %s373_s0 = inlined_call_operand.vmem [shape: f32[8,256], index: 0, kind: input, shape index: {}]   ;;  %s374_s1 = inlined_call_operand.vmem [shape: f32[256,10], index: 1, kind: input, shape index: {}]   ;;  %s375_s2 = inlined_call_operand.vmem [shape: f32[1,10], index: 2, kind: input, shape index: {}]   ;;  %s376_s3 = inlined_call_operand.hbm [shape: f32[8,10], index: 3, kind: output, shape index: {}]  }
   0x1   :  { %v33_v0 = vld [vmem:[%s374_s1 + $0x80] sm:$0xff]  ;;  %v34_v1 = vld [vmem:[%s374_s1 + $0x88] sm:$0xff]  ;;  %v35_v5 = vld [vmem:[%s374_s1 + $0x90] sm:$0xff] }
   0x2   :  { %v17_v2 = vld [vmem:[%s374_s1] sm:$0xff]  ;;  %v178_v3 = vpack.c.bf16 %v34_v1, %v33_v0  ;;  %v18_v4 = vld [vmem:[%s374_s1 + $0x8] sm:$0xff]  ;;  %v36_v6 = vld [vmem:[%s374_s1 + $0x98] sm:$0xff] }
   0x3   :  { %v180_v7 = vpack.c.bf16 %v18_v4, %v17_v2  ;;  %v182_v8 = vpack.c.bf16 %v36_v6, %v35_v5  ;;  %v19_v9 = vld [vmem:[%s374_s1 + $0x10] sm:$0xff]  ;;  %v20_v10 = vld [vmem:[%s374_s1 + $0x18] sm:$0xff]  ;;  %v37_v11 = vld [vmem:[%s374_s1 + $0xa0] sm:$0xff] }
   0x4   :  { %179 = vmatprep.subr.bf16.mxu0 %v178_v3  ;;  %v38_v12 = vld [vmem:[%s374_s1 + $0xa8] sm:$0xff]  ;;  %v184_v13 = vpack.c.bf16 %v20_v10, %v19_v9  ;;  %v21_v15 = vld [vmem:[%s374_s1 + $0x20] sm:$0xff]  ;;  %v39_v17 = vld [vmem:[%s374_s1 + $0xb0] sm:$0xff] }
   0x5   :  { %181 = vmatpush3.bf16.msra.mxu0 %v180_v7  ;;  %v186_v14 = vpack.c.bf16 %v38_v12, %v37_v11  ;;  %v22_v16 = vld [vmem:[%s374_s1 + $0x28] sm:$0xff]  ;;  %v40_v18 = vld [vmem:[%s374_s1 + $0xb8] sm:$0xff]  ;;  %v23_v21 = vld [vmem:[%s374_s1 + $0x30] sm:$0xff] }
   0x6   :  { %183 = vmatprep.subr.bf16.mxu0 %v182_v8  ;;  %v188_v19 = vpack.c.bf16 %v22_v16, %v21_v15  ;;  %v190_v20 = vpack.c.bf16 %v40_v18, %v39_v17  ;;  %v24_v22 = vld [vmem:[%s374_s1 + $0x38] sm:$0xff]  ;;  %v41_v23 = vld [vmem:[%s374_s1 + $0xc0] sm:$0xff]  ;;  %v42_v24 = vld [vmem:[%s374_s1 + $0xc8] sm:$0xff] }
   0x7   :  { %v16_v25 = vld [vmem:[%s373_s0 + $0x8] sm:$0xff] }
   0x8   :  { %120 = vmatprep.mubr.f32.mxu0 %v16_v25 }
   0x9   :  { %185 = vmatpush3.bf16.msra.mxu0 %v184_v13 }
   0xa   :  { %187 = vmatprep.subr.bf16.mxu0 %v186_v14 }
   0xb   :  { %8 = vsyncpa [#allocation3], 0  ;;  %v192_v26 = vpack.c.bf16 %v24_v22, %v23_v21  ;;  %v194_v27 = vpack.c.bf16 %v42_v24, %v41_v23  ;;  %v25_v28 = vld [vmem:[%s374_s1 + $0x40] sm:$0xff]  ;;  %v26_v29 = vld [vmem:[%s374_s1 + $0x48] sm:$0xff]  ;;  %s235_s28 = smov [#allocation2]   ;;  %vm126_vm0 = vcmask 80896  }
   0xc   :  { %v43_v30 = vld [vmem:[%s374_s1 + $0xd0] sm:$0xff]  ;;  %v44_v31 = vld [vmem:[%s374_s1 + $0xd8] sm:$0xff]  ;;  %v196_v32 = vpack.c.bf16 %v26_v29, %v25_v28  ;;  %v45_v36 = vld [vmem:[%s374_s1 + $0xe0] sm:$0xff]  ;;  %s134_s29 = sshll.u32 %s235_s28, 4  ;;  %s135_s29 = int_to_ptr.vmem [resolvable:$true] %s134_s29 }
   0xd   :  { %189 = vmatpush3.bf16.msra.mxu0 %v188_v19  ;;  %v198_v33 = vpack.c.bf16 %v44_v31, %v43_v30  ;;  %v27_v34 = vld [vmem:[%s374_s1 + $0x50] sm:$0xff]  ;;  %v28_v35 = vld [vmem:[%s374_s1 + $0x58] sm:$0xff]  ;;  %v46_v37 = vld [vmem:[%s374_s1 + $0xe8] sm:$0xff]  ;;  %p216_p1 = scmp.lt.s32.totalorder %s135_s29, %s135_s29 }
   0xe   :  { %191 = vmatprep.subr.bf16.mxu0 %v190_v20  ;;  %v200_v38 = vpack.c.bf16 %v28_v35, %v27_v34  ;;  %v202_v39 = vpack.c.bf16 %v46_v37, %v45_v36  ;;  %v29_v40 = vld [vmem:[%s374_s1 + $0x60] sm:$0xff]  ;;  %v30_v41 = vld [vmem:[%s374_s1 + $0x68] sm:$0xff]  ;;  %v47_v42 = vld [vmem:[%s374_s1 + $0xf0] sm:$0xff] }
   0xf   :  { %v48_v43 = vld [vmem:[%s374_s1 + $0xf8] sm:$0xff]  ;;  %v204_v44 = vpack.c.bf16 %v30_v41, %v29_v40  ;;  %v31_v46 = vld [vmem:[%s374_s1 + $0x70] sm:$0xff]  ;;  %v15_v49 = vld [vmem:[%s373_s0] sm:$0xff] }
  0x10   :  { %v206_v45 = vpack.c.bf16 %v48_v43, %v47_v42  ;;  %v32_v47 = vld [vmem:[%s374_s1 + $0x78] sm:$0xff]  ;;  %v142_v51 = vld [vmem:[%s375_s2] ss:$0 sm:$0xff]  ;;  %s211_s1 = scalar_lea.vmem %s135_s29, 128 }
  0x11   :  { %193 = vmatpush3.bf16.msra.mxu0 %v192_v26  ;;  %v208_v48 = vpack.c.bf16 %v32_v47, %v31_v46  ;;  %p212_p0 = scmp.ne.s32.totalorder %s135_s29, %s211_s1  ;;  %p217_p2 = scmp.lt.s32.totalorder %s211_s1, %s211_s1 }
  0x12   :  { %195 = vmatprep.subr.bf16.mxu0 %v194_v27 }
  0x13   :  { %p218_p3 = por %p217_p2, %p216_p1 }
  0x15   :  { %197 = vmatpush3.bf16.msra.mxu0 %v196_v32  ;;  %p219_p4 = pnand %p218_p3, %p212_p0 }
  0x16   :  { %199 = vmatprep.subr.bf16.mxu0 %v198_v33 }
  0x19   :  { %201 = vmatpush3.bf16.msra.mxu0 %v200_v38 }
  0x1a   :  { %203 = vmatprep.subr.bf16.mxu0 %v202_v39 }
  0x1d   :  { %205 = vmatpush3.bf16.msra.mxu0 %v204_v44 }
  0x1e   :  { %207 = vmatprep.subr.bf16.mxu0 %v206_v45 }
  0x21   :  { %209 = vmatpush3.bf16.msra.mxu0 %v208_v48 }
  0x24   :  { %121 = vmatmul.mubr.f32.vlgmr.msra.gmra.mrb[0].mxu0 %v15_v49 }
  0xf7   :  { %v175_v50 = vpop.f32.mrb[0].mxu0 }
  0xf8   :  { %v176_v52 = vpop.f32.mrb[1].mxu0 }
  0xf9   :  { %v177_v53 = vadd.f32 %v176_v52, %v175_v50 }
  0xfb   :  { %v123_v54 = vadd.f32 %v177_v53, %v142_v51 }
  0xfd   :  { %127 = vst.msk [vmem:[#allocation2] sm:$0xff] %vm126_vm0, %v123_v54 }
  0xfe   :  { %222 = shalt.err (!%p219_p4)
}
  0xff   :  { %s223_s4 = scalar_lea.hbm %s376_s3, 128 }
 0x100   :  { %p224_p5 = scmp.ne.s32.totalorder %s376_s3, %s223_s4  ;;  %p227_p6 = scmp.lt.u32.totalorder %s223_s4, %s376_s3 }
 0x102   :  { %p229_p7 = pnand %p227_p6, %p224_p5 }
 0x104   :  { %232 = shalt.err (!%p229_p7)
}
 0x105   :  { %137 = dma.vmem_to_hbm [thread:$0]  %s135_s29, 128, %s376_s3, [#allocation3]  }
 0x106   :  { %233 = dma.done.wait [#allocation3], 128  }
 0x107   :  { %234 = vsyncadd [#allocation3], 4294967168 }
 0x108   :  { %141 = vsyncpa [#allocation3], 1 }

</bundles_post_ra>
